<compile_context>
chip_gen: v7x
topology: tpu7x:2x2x1
jax: 0.10.0
libtpu: 0.0.40
codegen_flags: <defaults>
</compile_context>

<pallas_src>
import functools

import jax
import jax.numpy as jnp
from jax.experimental import pallas as pl
from jax.experimental.pallas import tpu as pltpu


def _round_up(n: int, m: int) -> int:
    return (n + m - 1) // m * m


def _fused_ffn_kernel(num_layers, x_ref, *refs):
    """refs = (w0, b0, w1, b1, ..., w_{L-1}, b_{L-1}, o_ref).

    x_ref : (TB, Din_pad)            current batch tile
    w_l   : (Din_l_pad, Dout_l_pad)  full layer weight, VMEM-resident
    b_l   : (1, Dout_l_pad)          full layer bias
    o_ref : (TB, Dout_last_pad)
    """
    o_ref = refs[-1]
    # Promote once; keep all intermediate activations in f32 on-chip.
    act = x_ref[...].astype(jnp.float32)
    for l in range(num_layers):
        w = refs[2 * l][...]
        b = refs[2 * l + 1][...]
        # MXU matmul with f32 accumulation; epilogue (bias + ReLU) on the f32 acc.
        y = jnp.dot(act.astype(w.dtype), w, preferred_element_type=jnp.float32)
        act = jnp.maximum(y + b.astype(jnp.float32), 0.0)
        # Dropout(p=0.0) == identity in inference.
    o_ref[...] = act.astype(o_ref.dtype)


def pack_params(weights, biases, dtype=jnp.float32):
    """One-time prepacking: transpose to (Din, Dout) and zero-pad feature dims
    to multiples of 128.  Hoists all transpose/reshape/pad work out of the
    forward path."""
    packed = []
    for w, b in zip(weights, biases):
        dout, din = w.shape
        din_p = _round_up(din, 128)
        dout_p = _round_up(dout, 128)
        w_t = jnp.zeros((din_p, dout_p), dtype).at[:din, :dout].set(
            jnp.asarray(w, dtype).T)
        b_p = jnp.zeros((1, dout_p), dtype).at[:, :dout].set(
            jnp.asarray(b, dtype))
        packed.append((w_t, b_p))
    return packed


@functools.partial(jax.jit, static_argnames=("out_dim", "block_b"))
def feed_forward(x, packed, *, out_dim, block_b=256):
    """Fused FeedForward forward: x -> [Linear -> ReLU -> Dropout(id)] * L."""
    B, Din = x.shape
    num_layers = len(packed)
    din_p = packed[0][0].shape[0]
    dout_last_p = packed[-1][0].shape[1]

    # Batch tile: multiple of 8 (sublane), capped at block_b.
    tb = min(_round_up(max(B, 1), 8), block_b)
    b_pad = _round_up(B, tb)

    # Pad input once (lane-dense Din, sublane-aligned batch).  No-op if aligned.
    if (b_pad, din_p) != (B, Din):
        x_p = jnp.zeros((b_pad, din_p), x.dtype).at[:B, :Din].set(x)
    else:
        x_p = x

    # Weights/biases: full-array blocks with batch-independent index_maps ->
    # DMA'd once, resident in VMEM across the whole grid.
    in_specs = [pl.BlockSpec((tb, din_p), lambda i: (i, 0))]
    flat_params = []
    param_bytes = 0
    for w_t, b_p in packed:
        in_specs.append(pl.BlockSpec(w_t.shape, lambda i: (0, 0)))
        in_specs.append(pl.BlockSpec(b_p.shape, lambda i: (0, 0)))
        flat_params.extend((w_t, b_p))
        param_bytes += w_t.size * w_t.dtype.itemsize + b_p.size * b_p.dtype.itemsize

    # VMEM budget: resident params + double-buffered x/out tiles + f32 act slack.
    itemsize = jnp.dtype(x.dtype).itemsize
    max_feat = max(spec[0].shape[1] for spec in packed)
    tile_bytes = 2 * tb * din_p * itemsize + 2 * tb * dout_last_p * itemsize
    act_bytes = 2 * tb * max(max_feat, din_p) * 4
    vmem_limit = min(64 << 20, max(16 << 20, 2 * (param_bytes + tile_bytes + act_bytes)))

    out_p = pl.pallas_call(
        functools.partial(_fused_ffn_kernel, num_layers),
        out_shape=jax.ShapeDtypeStruct((b_pad, dout_last_p), x.dtype),
        grid=(b_pad // tb,),
        in_specs=in_specs,
        out_specs=pl.BlockSpec((tb, dout_last_p), lambda i: (i, 0)),
        compiler_params=pltpu.CompilerParams(
            dimension_semantics=("parallel",),   # batch tiles are independent
            vmem_limit_bytes=vmem_limit,
        ),
    )(x_p, *flat_params)

    return out_p[:B, :out_dim]


def init_params(key, input_dim, hidden_dims):
    """Deterministic synthetic parameters matching nn.Linear shapes (Dout, Din)."""
    input_dims = [input_dim] + hidden_dims[:-1]
    weights, biases = [], []
    for din, dout in zip(input_dims, hidden_dims):
        key, kw, kb = jax.random.split(key, 3)
        bound = 1.0 / jnp.sqrt(jnp.float32(din))
        weights.append(jax.random.uniform(kw, (dout, din), jnp.float32, -bound, bound))
        biases.append(jax.random.uniform(kb, (dout,), jnp.float32, -bound, bound))
    return weights, biases


if __name__ == "__main__":
    # Small shapes consistent with the module's forward: x is [batch, input_dim].
    batch = 8
    input_dim = 32
    num_layers = 2
    hidden_dims = [64, 32]

    key = jax.random.PRNGKey(0)
    key, kx = jax.random.split(key)
    x = jax.random.normal(kx, (batch, input_dim), jnp.float32)

    weights, biases = init_params(key, input_dim, hidden_dims)

    # Prepack once (transpose + lane padding hoisted out of the forward path).
    packed = pack_params(weights, biases, dtype=jnp.float32)

    out = feed_forward(x, packed, out_dim=hidden_dims[-1])
    out = jax.block_until_ready(out)

    # Pure-JAX reference (Linear -> ReLU -> Dropout(identity)).
    ref = x
    for w, b in zip(weights, biases):
        ref = jnp.maximum(ref @ w.T + b, 0.0)

    assert out.shape == (batch, hidden_dims[-1])
    assert jnp.allclose(out, ref, atol=1e-5, rtol=1e-5)

    print("KERNEL_OK")
</pallas_src>

<mosaic_0001>
module attributes {stable_mosaic.version = 11 : i64} {
  func.func @_fused_ffn_kernel(%arg0: i32, %arg1: memref<8x128xf32, #tpu.memory_space<vmem>>, %arg2: memref<128x128xf32, #tpu.memory_space<vmem>>, %arg3: memref<1x128xf32, #tpu.memory_space<vmem>>, %arg4: memref<128x128xf32, #tpu.memory_space<vmem>>, %arg5: memref<1x128xf32, #tpu.memory_space<vmem>>, %arg6: memref<8x128xf32, #tpu.memory_space<vmem>>) attributes {dimension_semantics = [#tpu.dimension_semantics<parallel>], iteration_bounds = array<i64: 1>, scalar_prefetch = 0 : i64, scratch_operands = 0 : i64, tpu.core_type = #tpu.core_type<tc>, window_params = [{transform_indices = @transform_0, window_bounds = array<i64: 8, 128>}, {pipeline_mode = #tpu.pipeline_mode<synchronous>, transform_indices = @transform_1, window_bounds = array<i64: 128, 128>}, {pipeline_mode = #tpu.pipeline_mode<synchronous>, transform_indices = @transform_2, window_bounds = array<i64: 1, 128>}, {pipeline_mode = #tpu.pipeline_mode<synchronous>, transform_indices = @transform_3, window_bounds = array<i64: 128, 128>}, {pipeline_mode = #tpu.pipeline_mode<synchronous>, transform_indices = @transform_4, window_bounds = array<i64: 1, 128>}, {transform_indices = @transform_5, window_bounds = array<i64: 8, 128>}]} {
    %c0 = arith.constant 0 : index
    %c0_0 = arith.constant 0 : index
    %0 = vector.load %arg1[%c0, %c0_0] : memref<8x128xf32, #tpu.memory_space<vmem>>, vector<8x128xf32>
    %c0_1 = arith.constant 0 : index
    %c0_2 = arith.constant 0 : index
    %1 = vector.load %arg2[%c0_1, %c0_2] : memref<128x128xf32, #tpu.memory_space<vmem>>, vector<128x128xf32>
    %c0_3 = arith.constant 0 : index
    %c0_4 = arith.constant 0 : index
    %2 = vector.load %arg3[%c0_3, %c0_4] : memref<1x128xf32, #tpu.memory_space<vmem>>, vector<1x128xf32>
    %cst = arith.constant dense<0.000000e+00> : vector<8x128xf32>
    %3 = tpu.matmul %0, %1, %cst {dimension_numbers = #tpu.dot_dimension_numbers<[1], [0], [0], [1], [0, 0, 1, 1], [], []>} : vector<8x128xf32>, vector<128x128xf32>, vector<8x128xf32> -> vector<8x128xf32>
    %4 = vector.broadcast %2 : vector<1x128xf32> to vector<8x128xf32>
    %5 = arith.addf %3, %4 : vector<8x128xf32>
    %cst_5 = arith.constant 0.000000e+00 : f32
    %6 = vector.broadcast %cst_5 : f32 to vector<8x128xf32>
    %7 = arith.maximumf %5, %6 : vector<8x128xf32>
    %c0_6 = arith.constant 0 : index
    %c0_7 = arith.constant 0 : index
    %8 = vector.load %arg4[%c0_6, %c0_7] : memref<128x128xf32, #tpu.memory_space<vmem>>, vector<128x128xf32>
    %c0_8 = arith.constant 0 : index
    %c0_9 = arith.constant 0 : index
    %9 = vector.load %arg5[%c0_8, %c0_9] : memref<1x128xf32, #tpu.memory_space<vmem>>, vector<1x128xf32>
    %cst_10 = arith.constant dense<0.000000e+00> : vector<8x128xf32>
    %10 = tpu.matmul %7, %8, %cst_10 {dimension_numbers = #tpu.dot_dimension_numbers<[1], [0], [0], [1], [0, 0, 1, 1], [], []>} : vector<8x128xf32>, vector<128x128xf32>, vector<8x128xf32> -> vector<8x128xf32>
    %11 = vector.broadcast %9 : vector<1x128xf32> to vector<8x128xf32>
    %12 = arith.addf %10, %11 : vector<8x128xf32>
    %cst_11 = arith.constant 0.000000e+00 : f32
    %13 = vector.broadcast %cst_11 : f32 to vector<8x128xf32>
    %14 = arith.maximumf %12, %13 : vector<8x128xf32>
    %c0_12 = arith.constant 0 : index
    %c0_13 = arith.constant 0 : index
    %15 = vector.load %arg6[%c0_12, %c0_13] : memref<8x128xf32, #tpu.memory_space<vmem>>, vector<8x128xf32>
    tpu.vector_store %arg6[%c0_12, %c0_13], %14 {strides = array<i32>} : memref<8x128xf32, #tpu.memory_space<vmem>>, vector<8x128xf32>,
    return
  }
  func.func @transform_0(%arg0: i32) -> (i32, i32) {
    %c0_i32 = arith.constant 0 : i32
    %c0_i32_0 = arith.constant 0 : i32
    return %arg0, %c0_i32 : i32, i32
  }
  func.func @transform_1(%arg0: i32) -> (i32, i32) {
    %c0_i32 = arith.constant 0 : i32
    %c0_i32_0 = arith.constant 0 : i32
    %c0_i32_1 = arith.constant 0 : i32
    return %c0_i32, %c0_i32_0 : i32, i32
  }
  func.func @transform_2(%arg0: i32) -> (i32, i32) {
    %c0_i32 = arith.constant 0 : i32
    %c0_i32_0 = arith.constant 0 : i32
    %c0_i32_1 = arith.constant 0 : i32
    return %c0_i32, %c0_i32_0 : i32, i32
  }
  func.func @transform_3(%arg0: i32) -> (i32, i32) {
    %c0_i32 = arith.constant 0 : i32
    %c0_i32_0 = arith.constant 0 : i32
    %c0_i32_1 = arith.constant 0 : i32
    return %c0_i32, %c0_i32_0 : i32, i32
  }
  func.func @transform_4(%arg0: i32) -> (i32, i32) {
    %c0_i32 = arith.constant 0 : i32
    %c0_i32_0 = arith.constant 0 : i32
    %c0_i32_1 = arith.constant 0 : i32
    return %c0_i32, %c0_i32_0 : i32, i32
  }
  func.func @transform_5(%arg0: i32) -> (i32, i32) {
    %c0_i32 = arith.constant 0 : i32
    %c0_i32_0 = arith.constant 0 : i32
    return %arg0, %c0_i32 : i32, i32
  }
}

</mosaic_0001>

<bundles_post_ra>
// kernel: feed_forward.1
= control target key start
LH: loop header
LB: loop body
LE: loop exit
PB: predicated region body
PF: predicated region fallthrough
CT: control target
= control target key end

     0   :  { %10 = vsyncpa [#allocation3], 0  ;;  %s588_s0 = inlined_call_operand.vmem [shape: f32[8,128], index: 0, kind: input, shape index: {}]   ;;  %s589_s1 = inlined_call_operand.hbm [shape: f32[128,128], index: 1, kind: input, shape index: {}]   ;;  %s590_s2 = inlined_call_operand.vmem [shape: f32[1,128], index: 2, kind: input, shape index: {}]   ;;  %s591_s3 = inlined_call_operand.hbm [shape: f32[128,128], index: 3, kind: input, shape index: {}]   ;;  %s592_s4 = inlined_call_operand.vmem [shape: f32[1,128], index: 4, kind: input, shape index: {}]   ;;  %s593_s5 = inlined_call_operand.hbm [shape: f32[8,128], index: 5, kind: output, shape index: {}]  }
   0x1   :  { %11 = vsyncpa [#allocation6], 0 }
   0x2   :  { %12 = vsyncpa [#allocation4], 0  ;;  %s489_s18 = smov [#allocation2]   ;;  %s417_s22 = scalar_lea.hbm %s589_s1, 2048 }
   0x3   :  { %s20_s19 = sshll.u32 %s489_s18, 4  ;;  %p418_p0 = scmp.ne.s32.totalorder %s589_s1, %s417_s22  ;;  %s21_s19 = int_to_ptr.vmem [resolvable:$true] %s20_s19 }
   0x4   :  { %p421_p1 = scmp.lt.u32.totalorder %s417_s22, %s589_s1 }
   0x6   :  { %p423_p2 = pnand %p421_p1, %p418_p0 }
   0x8   :  { %426 = shalt.err (!%p423_p2)
}
   0x9   :  { %s427_s27 = scalar_lea.vmem %s21_s19, 2048  ;;  %p432_p4 = scmp.lt.s32.totalorder %s21_s19, %s21_s19 }
   0xa   :  { %p428_p3 = scmp.ne.s32.totalorder %s21_s19, %s427_s27  ;;  %p433_p5 = scmp.lt.s32.totalorder %s427_s27, %s427_s27 }
   0xc   :  { %p434_p6 = por %p433_p5, %p432_p4 }
   0xe   :  { %p435_p7 = pnand %p434_p6, %p428_p3 }
  0x10   :  { %438 = shalt.err (!%p435_p7)
}
  0x11   :  { %s490_s28 = smov 128   ;;  %s491_s29 = smov 8  }
  0x12   :  { %26 = dma.hbm_to_vmem [thread:$0]  %s589_s1, 2048, %s21_s19, [#allocation3], %s490_s28, %s490_s28, %s491_s29  }
  0x13   :  { %s492_s7 = smov [#allocation5]   ;;  %s439_s11 = scalar_lea.hbm %s591_s3, 2048 }
  0x14   :  { %s34_s8 = sshll.u32 %s492_s7, 4  ;;  %p440_p8 = scmp.ne.s32.totalorder %s591_s3, %s439_s11  ;;  %s35_s8 = int_to_ptr.vmem [resolvable:$true] %s34_s8 }
  0x15   :  { %p443_p9 = scmp.lt.u32.totalorder %s439_s11, %s591_s3 }
  0x17   :  { %p445_p10 = pnand %p443_p9, %p440_p8 }
  0x19   :  { %448 = shalt.err (!%p445_p10)
}
  0x1a   :  { %s449_s16 = scalar_lea.vmem %s35_s8, 2048  ;;  %p454_p12 = scmp.lt.s32.totalorder %s35_s8, %s35_s8 }
  0x1b   :  { %p450_p11 = scmp.ne.s32.totalorder %s35_s8, %s449_s16  ;;  %p455_p13 = scmp.lt.s32.totalorder %s449_s16, %s449_s16 }
  0x1d   :  { %p456_p0 = por %p455_p13, %p454_p12 }
  0x1f   :  { %p457_p1 = pnand %p456_p0, %p450_p11 }
  0x21   :  { %460 = shalt.err (!%p457_p1)
}
  0x22   :  { %40 = dma.hbm_to_vmem [thread:$0]  %s591_s3, 2048, %s35_s8, [#allocation6], %s490_s28, %s490_s28, %s491_s29  }
  0x23   :  { %483 = dma.done.wait [#allocation3], 2048  }
  0x24   :  { %484 = vsyncadd [#allocation3], 4294965248 }
  0x25   :  { %485 = dma.done.wait [#allocation6], 2048  }
  0x26   :  { %486 = vsyncadd [#allocation6], 4294965248  ;;  %v493_v0 = vmov 0.0|0.0   ;;  %vm494_vm0 = vmmov 0   ;;  %v495_v1 = vmov 0.0   ;;  %v50_v2 = vld [vmem:[#allocation2] sm:$0xff] }
  0x27   :  { %361 = vmatprep.subr.bf16.mxu0 %v493_v0  ;;  %323 = vmatprep.mubr.msk.f32.mxu0 %vm494_vm0, %v495_v1  ;;  %v51_v3 = vld [vmem:[#allocation2 + $0x8] sm:$0xff]  ;;  %v52_v4 = vld [vmem:[#allocation2 + $0x10] sm:$0xff]  ;;  %v53_v6 = vld [vmem:[#allocation2 + $0x18] sm:$0xff] }
  0x28   :  { %385 = vmatprep.subr.bf16.mxu1 %v493_v0  ;;  %358 = vmatprep.mubr.msk.f32.mxu1 %vm494_vm0, %v495_v1  ;;  %v362_v5 = vpack.c.bf16 %v51_v3, %v50_v2  ;;  %v365_v7 = vpack.c.bf16 %v53_v6, %v52_v4  ;;  %v54_v8 = vld [vmem:[#allocation2 + $0x20] sm:$0xff]  ;;  %v55_v9 = vld [vmem:[#allocation2 + $0x28] sm:$0xff]  ;;  %v146_v12 = vld [vmem:[#allocation5 + $0x10] sm:$0xff] }
  0x29   :  { %v144_v10 = vld [vmem:[#allocation5] sm:$0xff]  ;;  %v145_v11 = vld [vmem:[#allocation5 + $0x8] sm:$0xff]  ;;  %v147_v13 = vld [vmem:[#allocation5 + $0x18] sm:$0xff]  ;;  %v368_v14 = vpack.c.bf16 %v55_v9, %v54_v8 }
  0x2a   :  { %363 = vmatpush3.bf16.msra.mxu0 %v362_v5  ;;  %v386_v15 = vpack.c.bf16 %v145_v11, %v144_v10  ;;  %v56_v16 = vld [vmem:[#allocation2 + $0x30] sm:$0xff]  ;;  %v57_v17 = vld [vmem:[#allocation2 + $0x38] sm:$0xff]  ;;  %v389_v18 = vpack.c.bf16 %v147_v13, %v146_v12  ;;  %v148_v19 = vld [vmem:[#allocation5 + $0x20] sm:$0xff] }
  0x2b   :  { %364 = vmatprep.subr.bf16.mxu0 %v493_v0  ;;  %v149_v20 = vld [vmem:[#allocation5 + $0x28] sm:$0xff]  ;;  %v371_v21 = vpack.c.bf16 %v57_v17, %v56_v16  ;;  %v58_v22 = vld [vmem:[#allocation2 + $0x40] sm:$0xff]  ;;  %v150_v25 = vld [vmem:[#allocation5 + $0x30] sm:$0xff] }
  0x2c   :  { %387 = vmatpush3.bf16.msra.mxu1 %v386_v15  ;;  %v59_v23 = vld [vmem:[#allocation2 + $0x48] sm:$0xff]  ;;  %v392_v24 = vpack.c.bf16 %v149_v20, %v148_v19  ;;  %v151_v26 = vld [vmem:[#allocation5 + $0x38] sm:$0xff]  ;;  %v60_v28 = vld [vmem:[#allocation2 + $0x50] sm:$0xff] }
  0x2d   :  { %388 = vmatprep.subr.bf16.mxu1 %v493_v0  ;;  %v374_v27 = vpack.c.bf16 %v59_v23, %v58_v22  ;;  %v61_v29 = vld [vmem:[#allocation2 + $0x58] sm:$0xff]  ;;  %v395_v30 = vpack.c.bf16 %v151_v26, %v150_v25  ;;  %v152_v31 = vld [vmem:[#allocation5 + $0x40] sm:$0xff]  ;;  %v153_v32 = vld [vmem:[#allocation5 + $0x48] sm:$0xff] }
  0x2e   :  { %366 = vmatpush3.bf16.msra.mxu0 %v365_v7  ;;  %v377_v33 = vpack.c.bf16 %v61_v29, %v60_v28  ;;  %v62_v34 = vld [vmem:[#allocation2 + $0x60] sm:$0xff]  ;;  %v63_v35 = vld [vmem:[#allocation2 + $0x68] sm:$0xff]  ;;  %v398_v36 = vpack.c.bf16 %v153_v32, %v152_v31  ;;  %v154_v37 = vld [vmem:[#allocation5 + $0x50] sm:$0xff] }
  0x2f   :  { %367 = vmatprep.subr.bf16.mxu0 %v493_v0  ;;  %v155_v38 = vld [vmem:[#allocation5 + $0x58] sm:$0xff]  ;;  %v380_v39 = vpack.c.bf16 %v63_v35, %v62_v34  ;;  %v64_v40 = vld [vmem:[#allocation2 + $0x70] sm:$0xff]  ;;  %v156_v43 = vld [vmem:[#allocation5 + $0x60] sm:$0xff] }
  0x30   :  { %390 = vmatpush3.bf16.msra.mxu1 %v389_v18  ;;  %v65_v41 = vld [vmem:[#allocation2 + $0x78] sm:$0xff]  ;;  %v401_v42 = vpack.c.bf16 %v155_v38, %v154_v37  ;;  %v157_v44 = vld [vmem:[#allocation5 + $0x68] sm:$0xff]  ;;  %v49_v47 = vld [vmem:[%s588_s0] sm:$0xff]  ;;  %s496_s0 = smov [#allocation7]  }
  0x31   :  { %391 = vmatprep.subr.bf16.mxu1 %v493_v0  ;;  %v383_v45 = vpack.c.bf16 %v65_v41, %v64_v40  ;;  %v404_v46 = vpack.c.bf16 %v157_v44, %v156_v43  ;;  %v158_v48 = vld [vmem:[#allocation5 + $0x70] sm:$0xff]  ;;  %v159_v49 = vld [vmem:[#allocation5 + $0x78] sm:$0xff]  ;;  %v255_v51 = vld [vmem:[%s590_s2] ss:$0 sm:$0xff]  ;;  %s245_s23 = sshll.u32 %s496_s0, 4  ;;  %s246_s23 = int_to_ptr.vmem [resolvable:$true] %s245_s23 }
  0x32   :  { %369 = vmatpush3.bf16.msra.mxu0 %v368_v14  ;;  %v407_v50 = vpack.c.bf16 %v159_v49, %v158_v48  ;;  %v256_v56 = vld [vmem:[%s592_s4] ss:$0 sm:$0xff]  ;;  %s461_s24 = scalar_lea.vmem %s246_s23, 128  ;;  %p466_p3 = scmp.lt.s32.totalorder %s246_s23, %s246_s23 }
  0x33   :  { %370 = vmatprep.subr.bf16.mxu0 %v493_v0  ;;  %p462_p2 = scmp.ne.s32.totalorder %s246_s23, %s461_s24  ;;  %p467_p4 = scmp.lt.s32.totalorder %s461_s24, %s461_s24 }
  0x34   :  { %393 = vmatpush3.bf16.msra.mxu1 %v392_v24 }
  0x35   :  { %394 = vmatprep.subr.bf16.mxu1 %v493_v0  ;;  %p468_p5 = por %p467_p4, %p466_p3 }
  0x36   :  { %372 = vmatpush3.bf16.msra.mxu0 %v371_v21 }
  0x37   :  { %373 = vmatprep.subr.bf16.mxu0 %v493_v0  ;;  %p469_p6 = pnand %p468_p5, %p462_p2 }
  0x38   :  { %396 = vmatpush3.bf16.msra.mxu1 %v395_v30 }
  0x39   :  { %397 = vmatprep.subr.bf16.mxu1 %v493_v0 }
  0x3a   :  { %375 = vmatpush3.bf16.msra.mxu0 %v374_v27 }
  0x3b   :  { %376 = vmatprep.subr.bf16.mxu0 %v493_v0 }
  0x3c   :  { %399 = vmatpush3.bf16.msra.mxu1 %v398_v36 }
  0x3d   :  { %400 = vmatprep.subr.bf16.mxu1 %v493_v0 }
  0x3e   :  { %378 = vmatpush3.bf16.msra.mxu0 %v377_v33 }
  0x3f   :  { %379 = vmatprep.subr.bf16.mxu0 %v493_v0 }
  0x40   :  { %402 = vmatpush3.bf16.msra.mxu1 %v401_v42 }
  0x41   :  { %403 = vmatprep.subr.bf16.mxu1 %v493_v0 }
  0x42   :  { %381 = vmatpush3.bf16.msra.mxu0 %v380_v39 }
  0x43   :  { %382 = vmatprep.subr.bf16.mxu0 %v493_v0 }
  0x44   :  { %405 = vmatpush3.bf16.msra.mxu1 %v404_v46 }
  0x45   :  { %406 = vmatprep.subr.bf16.mxu1 %v493_v0 }
  0x46   :  { %384 = vmatpush3.bf16.msra.mxu0 %v383_v45 }
  0x48   :  { %408 = vmatpush3.bf16.msra.mxu1 %v407_v50 }
  0x49   :  { %324 = vmatmul.mubr.f32.vlgmr.msra.gmra.mrb[0].mxu0 %v49_v47 }
 0x11c   :  { %v139_v52 = vpop.f32.mrb[0].mxu0 }
 0x11d   :  { %v140_v53 = vadd.f32 %v255_v51, %v139_v52  ;;  %v325_v54 = vpop.f32.mrb[1].mxu0 }
 0x11f   :  { %v143_v55 = vmax.f32 %v140_v53, 0.0 }
 0x121   :  { %359 = vmatmul.mubr.f32.vlgmr.msra.gmra.mrb[0].mxu1 %v143_v55 }
 0x1f4   :  { %v233_v57 = vpop.f32.mrb[0].mxu1 }
 0x1f5   :  { %v234_v58 = vadd.f32 %v256_v56, %v233_v57  ;;  %v360_v59 = vpop.f32.mrb[1].mxu1 }
 0x1f7   :  { %v237_v60 = vmax.f32 %v234_v58, 0.0 }
 0x1f9   :  { %238 = vst [vmem:[#allocation7] sm:$0xff] %v237_v60 }
 0x1fa   :  { %472 = shalt.err (!%p469_p6)
}
 0x1fb   :  { %s473_s26 = scalar_lea.hbm %s593_s5, 128 }
 0x1fc   :  { %p474_p7 = scmp.ne.s32.totalorder %s593_s5, %s473_s26  ;;  %p477_p8 = scmp.lt.u32.totalorder %s473_s26, %s593_s5 }
 0x1fe   :  { %p479_p9 = pnand %p477_p8, %p474_p7 }
 0x200   :  { %482 = shalt.err (!%p479_p9)
}
 0x201   :  { %248 = dma.vmem_to_hbm [thread:$0]  %s246_s23, 128, %s593_s5, [#allocation4]  }
 0x202   :  { %487 = dma.done.wait [#allocation4], 128  }
 0x203   :  { %488 = vsyncadd [#allocation4], 4294967168 }
 0x204   :  { %252 = vsyncpa [#allocation3], 1 }
 0x205   :  { %253 = vsyncpa [#allocation6], 1 }
 0x206   :  { %254 = vsyncpa [#allocation4], 1 }

</bundles_post_ra>
